<compile_context>
chip_gen: v6e
topology: v6e:2x2x1
jax: 0.10.0
libtpu: 0.0.40
codegen_flags: <defaults>
</compile_context>

<pallas_src>
import math
import jax
import jax.numpy as jnp
from jax.experimental import pallas as pl
from jax.experimental.pallas import tpu as pltpu


def _block_diag_in_out(w):
    """(H, dh, dh) stack of nn.Linear weights (out,in) -> (d, d) block-diagonal, (in,out) layout."""
    H, dh, _ = w.shape
    d = H * dh
    bd = jnp.zeros((d, d), dtype=w.dtype)
    for h in range(H):
        bd = bd.at[h * dh:(h + 1) * dh, h * dh:(h + 1) * dh].set(w[h].T)
    return bd


def _estimate_vmem_bytes(bt, S, d, H):
    """Rough per-grid-step VMEM footprint (double-buffered I/O + live intermediates)."""
    rows = bt * S
    x_blk = rows * d * 2                        # bf16 input block
    out_blk = rows * d * 4                      # f32 output block
    weights = d * 3 * d * 2 + 3 * d * 4         # bf16 fused weight + f32 fused bias
    qkv = rows * 3 * d * (4 + 2)                # f32 projection result + bf16 copy
    logits = bt * S * S * 4 * 3                 # f32 logits / exp / attn live per head
    head_out = rows * d * 4                     # concatenated head outputs (f32)
    return 2 * (x_blk + out_blk + weights) + qkv + logits + head_out


def _pick_bt(B, S, d, H, vmem_budget=12 << 20):
    """Largest divisor of B whose per-step footprint fits a conservative VMEM budget.

    Megacore note: only prefer >= 2 'parallel' grid steps once a step is large enough to be
    compute-bound; each extra step costs ~0.35 us fixed overhead, which dominates tiny blocks.
    v5e note: for large shapes prefer bt*S aligned to multiples of 128 (MXU M-pass width).
    """
    divisors = [c for c in range(1, B + 1) if B % c == 0]
    fitting = [c for c in divisors if _estimate_vmem_bytes(c, S, d, H) <= vmem_budget]
    bt = max(fitting) if fitting else 1
    if bt == B and B % 2 == 0 and (B // 2) * S >= 256:
        bt = B // 2   # expose >=2 parallel steps for the 2-TensorCore generations
    return bt


def make_msa_kernel(Bt, S, d, n_heads):
    dh = d // n_heads

    def msa_kernel(x_ref, wqkv_ref, bqkv_ref, o_ref):
        # x_ref:    (Bt*S, d)  bf16
        # wqkv_ref: (d, 3d)    bf16 block-diagonal (in,out), softmax scale folded into q block
        # bqkv_ref: (1, 3d)    f32  concatenated biases (q scaled)
        # o_ref:    (Bt*S, d)  f32
        # Fused q/k/v projection: one MXU pass, bf16 inputs, f32 accumulation + f32 bias.
        qkv = jnp.dot(x_ref[...], wqkv_ref[...],
                      preferred_element_type=jnp.float32) + bqkv_ref[...]
        # Single bf16 cast (MXU feed for the attention matmuls); softmax math stays f32.
        qkv_bf = qkv.astype(jnp.bfloat16).reshape(Bt, S, 3 * d)   # leading-dim split only

        # Per-head attention. H is tiny & static here; with d=32 every vreg is lane-sparse
        # regardless, so the static loop is cheap.
        # TODO(synk): for larger H, batch heads into the contraction batch dim (head-major
        #             wrapper-side layout) instead of this loop; for large S, add a q-tile
        #             grid axis with online softmax so the (S, S) logits never fully
        #             materialize (matters first on v7x's 64 MiB VMEM).
        outs = []
        for h in range(n_heads):
            qh = qkv_bf[:, :, h * dh:(h + 1) * dh]
            kh = qkv_bf[:, :, d + h * dh:d + (h + 1) * dh]
            vh = qkv_bf[:, :, 2 * d + h * dh:2 * d + (h + 1) * dh]

            # q @ k.T without an in-kernel transpose (contract last dims). Scale already folded.
            logits = jnp.einsum('bqd,bkd->bqk', qh, kh,
                                preferred_element_type=jnp.float32)
            m = jnp.max(logits, axis=-1, keepdims=True)
            p = jnp.exp(logits - m)
            denom = jnp.sum(p, axis=-1, keepdims=True)
            # EUP reciprocal (frees VALU); ~1e-3 relative error on softmax row sums.
            attn = p * pl.reciprocal(denom, approx=True)

            outs.append(jnp.einsum('bqk,bkd->bqd', attn.astype(jnp.bfloat16), vh,
                                   preferred_element_type=jnp.float32))

        out = jnp.concatenate(outs, axis=-1)                       # (Bt, S, d) f32, head order
        o_ref[...] = out.reshape(Bt * S, d).astype(o_ref.dtype)    # single 2-D lane-dense store

    return msa_kernel


def my_msa(x, wq, bq, wk, bk, wv, bv, bt=None):
    """x: (B, S, d) f32; wq/wk/wv: (H, d_head, d_head) (nn.Linear (out,in)); bq/bk/bv: (H, d_head)."""
    B, S, d = x.shape
    H, dh, _ = wq.shape
    assert d == H * dh
    scale = 1.0 / math.sqrt(dh)

    if bt is None:
        bt = _pick_bt(B, S, d, H)
    assert B % bt == 0
    grid = (B // bt,)

    # Wrapper-side layout plumbing (free): fused block-diagonal (in,out) qkv weight with the
    # softmax scale folded into the q block, fused bias, flat 2-D bf16 activations.
    x2 = x.reshape(B * S, d).astype(jnp.bfloat16)
    wqkv = jnp.concatenate(
        [_block_diag_in_out(wq) * scale, _block_diag_in_out(wk), _block_diag_in_out(wv)],
        axis=1).astype(jnp.bfloat16)                               # (d, 3d)
    bqkv = jnp.concatenate(
        [bq.reshape(-1) * scale, bk.reshape(-1), bv.reshape(-1)]
    ).reshape(1, 3 * d).astype(jnp.float32)                        # (1, 3d)

    kernel = make_msa_kernel(bt, S, d, H)

    grid_spec = pltpu.PrefetchScalarGridSpec(
        num_scalar_prefetch=0,
        grid=grid,
        in_specs=[
            pl.BlockSpec((bt * S, d), lambda b: (b, 0)),       # x slab: bt sequences per step
            pl.BlockSpec((d, 3 * d), lambda b: (0, 0)),        # fused qkv weight (grid-invariant)
            pl.BlockSpec((1, 3 * d), lambda b: (0, 0)),        # fused bias (grid-invariant)
        ],
        out_specs=pl.BlockSpec((bt * S, d), lambda b: (b, 0)),
    )

    # Advisory cost so XLA can overlap this custom call with neighboring ops.
    flops = 2 * (B * S) * d * (3 * d) + 4 * B * H * S * S * dh
    transcendentals = B * H * S * S
    bytes_accessed = (B * S * d * 2) + (d * 3 * d * 2) + (3 * d * 4) + (B * S * d * 4)
    cost = pl.CostEstimate(flops=flops, transcendentals=transcendentals,
                           bytes_accessed=bytes_accessed)

    vmem_bytes = _estimate_vmem_bytes(bt, S, d, H)
    vmem_limit = min(2 * vmem_bytes, 64 << 20) if vmem_bytes > (12 << 20) else None

    out2 = pl.pallas_call(
        kernel,
        out_shape=jax.ShapeDtypeStruct((B * S, d), x.dtype),
        grid_spec=grid_spec,
        compiler_params=pltpu.CompilerParams(
            dimension_semantics=("parallel",),
            vmem_limit_bytes=vmem_limit),
        cost_estimate=cost,
    )(x2, wqkv, bqkv)

    return out2.reshape(B, S, d)


def my_msa_reference(x, wq, bq, wk, bk, wv, bv):
    """Pure-JAX f32 reference mirroring the PyTorch loop semantics."""
    B, S, d = x.shape
    H, dh, _ = wq.shape
    scale = 1.0 / math.sqrt(dh)
    outs = []
    for b in range(B):
        heads = []
        for h in range(H):
            seq = x[b, :, h * dh:(h + 1) * dh]
            q = seq @ wq[h].T + bq[h]
            k = seq @ wk[h].T + bk[h]
            v = seq @ wv[h].T + bv[h]
            attn = jax.nn.softmax(q @ k.T * scale, axis=-1)
            heads.append(attn @ v)
        outs.append(jnp.concatenate(heads, axis=-1))
    return jnp.stack(outs, axis=0)


if __name__ == "__main__":
    # Small shapes consistent with MyMSA(d=32, n_heads=2) on sequences of length 8.
    B, S, d, n_heads = 2, 8, 32, 2
    d_head = d // n_heads

    key = jax.random.PRNGKey(0)
    kx, kwq, kbq, kwk, kbk, kwv, kbv = jax.random.split(key, 7)

    x = jax.random.normal(kx, (B, S, d), dtype=jnp.float32)

    # Deterministic parameter init (uniform, like nn.Linear default range).
    lim = 1.0 / math.sqrt(d_head)
    wq = jax.random.uniform(kwq, (n_heads, d_head, d_head), jnp.float32, -lim, lim)
    bq = jax.random.uniform(kbq, (n_heads, d_head), jnp.float32, -lim, lim)
    wk = jax.random.uniform(kwk, (n_heads, d_head, d_head), jnp.float32, -lim, lim)
    bk = jax.random.uniform(kbk, (n_heads, d_head), jnp.float32, -lim, lim)
    wv = jax.random.uniform(kwv, (n_heads, d_head, d_head), jnp.float32, -lim, lim)
    bv = jax.random.uniform(kbv, (n_heads, d_head), jnp.float32, -lim, lim)

    out = my_msa(x, wq, bq, wk, bk, wv, bv)
    out = jax.block_until_ready(out)

    ref = my_msa_reference(x, wq, bq, wk, bk, wv, bv)
    assert out.shape == (B, S, d)
    # bf16 MXU inputs + approx reciprocal -> loosened tolerance vs. f32 reference.
    assert jnp.allclose(out, ref, atol=5e-2, rtol=5e-2), "mismatch vs reference"

    print("KERNEL_OK")
</pallas_src>

<mosaic_0001>
module attributes {stable_mosaic.version = 11 : i64} {
  func.func @msa_kernel(%arg0: i32, %arg1: memref<16x32xbf16, #tpu.memory_space<vmem>>, %arg2: memref<32x96xbf16, #tpu.memory_space<vmem>>, %arg3: memref<1x96xf32, #tpu.memory_space<vmem>>, %arg4: memref<16x32xf32, #tpu.memory_space<vmem>>) attributes {dimension_semantics = [#tpu.dimension_semantics<parallel>], iteration_bounds = array<i64: 1>, scalar_prefetch = 0 : i64, scratch_operands = 0 : i64, tpu.core_type = #tpu.core_type<tc>, window_params = [{transform_indices = @transform_0, window_bounds = array<i64: 16, 32>}, {pipeline_mode = #tpu.pipeline_mode<synchronous>, transform_indices = @transform_1, window_bounds = array<i64: 32, 96>}, {pipeline_mode = #tpu.pipeline_mode<synchronous>, transform_indices = @transform_2, window_bounds = array<i64: 1, 96>}, {transform_indices = @transform_3, window_bounds = array<i64: 16, 32>}]} {
    %c0 = arith.constant 0 : index
    %c0_0 = arith.constant 0 : index
    %0 = vector.load %arg1[%c0, %c0_0] : memref<16x32xbf16, #tpu.memory_space<vmem>>, vector<16x32xbf16>
    %c0_1 = arith.constant 0 : index
    %c0_2 = arith.constant 0 : index
    %1 = vector.load %arg2[%c0_1, %c0_2] : memref<32x96xbf16, #tpu.memory_space<vmem>>, vector<32x96xbf16>
    %cst = arith.constant dense<0.000000e+00> : vector<16x96xf32>
    %2 = tpu.matmul %0, %1, %cst {dimension_numbers = #tpu.dot_dimension_numbers<[1], [0], [0], [1], [0, 0, 1, 1], [], []>} : vector<16x32xbf16>, vector<32x96xbf16>, vector<16x96xf32> -> vector<16x96xf32>
    %c0_3 = arith.constant 0 : index
    %c0_4 = arith.constant 0 : index
    %3 = vector.load %arg3[%c0_3, %c0_4] : memref<1x96xf32, #tpu.memory_space<vmem>>, vector<1x96xf32>
    %4 = vector.broadcast %3 : vector<1x96xf32> to vector<16x96xf32>
    %5 = arith.addf %2, %4 : vector<16x96xf32>
    %6 = arith.truncf %5 : vector<16x96xf32> to vector<16x96xbf16>
    %7 = vector.shape_cast %6 : vector<16x96xbf16> to vector<2x8x96xbf16>
    %8 = vector.extract_strided_slice %7 {offsets = [0, 0, 0], sizes = [2, 8, 16], strides = [1, 1, 1]} : vector<2x8x96xbf16> to vector<2x8x16xbf16>
    %9 = vector.extract_strided_slice %7 {offsets = [0, 0, 32], sizes = [2, 8, 16], strides = [1, 1, 1]} : vector<2x8x96xbf16> to vector<2x8x16xbf16>
    %10 = vector.extract_strided_slice %7 {offsets = [0, 0, 64], sizes = [2, 8, 16], strides = [1, 1, 1]} : vector<2x8x96xbf16> to vector<2x8x16xbf16>
    "tpu.trace_start"() <{level = 10 : i32, message = "bqd,bkd->bqk"}> : () -> ()
    %cst_5 = arith.constant dense<0.000000e+00> : vector<2x8x8xf32>
    %11 = tpu.matmul %8, %9, %cst_5 {dimension_numbers = #tpu.dot_dimension_numbers<[2], [2], [1], [1], [0, 0, 0, 1, 1, 1], [0], [0]>} : vector<2x8x16xbf16>, vector<2x8x16xbf16>, vector<2x8x8xf32> -> vector<2x8x8xf32>
    "tpu.trace_stop"() : () -> ()
    %cst_6 = arith.constant dense<0xFF800000> : vector<2x8xf32>
    %12 = vector.multi_reduction <maximumf>, %11, %cst_6 [2] : vector<2x8x8xf32> to vector<2x8xf32>
    %13 = vector.shape_cast %12 : vector<2x8xf32> to vector<2x8x1xf32>
    %14 = vector.broadcast %13 : vector<2x8x1xf32> to vector<2x8x8xf32>
    %15 = arith.subf %11, %14 : vector<2x8x8xf32>
    %16 = math.exp %15 : vector<2x8x8xf32>
    %cst_7 = arith.constant dense<0.000000e+00> : vector<2x8xf32>
    %17 = vector.multi_reduction <add>, %16, %cst_7 [2] : vector<2x8x8xf32> to vector<2x8xf32>
    %18 = vector.shape_cast %17 : vector<2x8xf32> to vector<2x8x1xf32>
    %19 = tpu.reciprocal %18 {approx = true} : vector<2x8x1xf32> -> vector<2x8x1xf32>
    %20 = vector.broadcast %19 : vector<2x8x1xf32> to vector<2x8x8xf32>
    %21 = arith.mulf %16, %20 : vector<2x8x8xf32>
    %22 = arith.truncf %21 : vector<2x8x8xf32> to vector<2x8x8xbf16>
    "tpu.trace_start"() <{level = 10 : i32, message = "bqk,bkd->bqd"}> : () -> ()
    %cst_8 = arith.constant dense<0.000000e+00> : vector<2x8x16xf32>
    %23 = tpu.matmul %22, %10, %cst_8 {dimension_numbers = #tpu.dot_dimension_numbers<[2], [1], [1], [2], [0, 0, 0, 1, 1, 2], [0], [0]>} : vector<2x8x8xbf16>, vector<2x8x16xbf16>, vector<2x8x16xf32> -> vector<2x8x16xf32>
    "tpu.trace_stop"() : () -> ()
    %24 = vector.extract_strided_slice %7 {offsets = [0, 0, 16], sizes = [2, 8, 16], strides = [1, 1, 1]} : vector<2x8x96xbf16> to vector<2x8x16xbf16>
    %25 = vector.extract_strided_slice %7 {offsets = [0, 0, 48], sizes = [2, 8, 16], strides = [1, 1, 1]} : vector<2x8x96xbf16> to vector<2x8x16xbf16>
    %26 = vector.extract_strided_slice %7 {offsets = [0, 0, 80], sizes = [2, 8, 16], strides = [1, 1, 1]} : vector<2x8x96xbf16> to vector<2x8x16xbf16>
    "tpu.trace_start"() <{level = 10 : i32, message = "bqd,bkd->bqk"}> : () -> ()
    %cst_9 = arith.constant dense<0.000000e+00> : vector<2x8x8xf32>
    %27 = tpu.matmul %24, %25, %cst_9 {dimension_numbers = #tpu.dot_dimension_numbers<[2], [2], [1], [1], [0, 0, 0, 1, 1, 1], [0], [0]>} : vector<2x8x16xbf16>, vector<2x8x16xbf16>, vector<2x8x8xf32> -> vector<2x8x8xf32>
    "tpu.trace_stop"() : () -> ()
    %cst_10 = arith.constant dense<0xFF800000> : vector<2x8xf32>
    %28 = vector.multi_reduction <maximumf>, %27, %cst_10 [2] : vector<2x8x8xf32> to vector<2x8xf32>
    %29 = vector.shape_cast %28 : vector<2x8xf32> to vector<2x8x1xf32>
    %30 = vector.broadcast %29 : vector<2x8x1xf32> to vector<2x8x8xf32>
    %31 = arith.subf %27, %30 : vector<2x8x8xf32>
    %32 = math.exp %31 : vector<2x8x8xf32>
    %cst_11 = arith.constant dense<0.000000e+00> : vector<2x8xf32>
    %33 = vector.multi_reduction <add>, %32, %cst_11 [2] : vector<2x8x8xf32> to vector<2x8xf32>
    %34 = vector.shape_cast %33 : vector<2x8xf32> to vector<2x8x1xf32>
    %35 = tpu.reciprocal %34 {approx = true} : vector<2x8x1xf32> -> vector<2x8x1xf32>
    %36 = vector.broadcast %35 : vector<2x8x1xf32> to vector<2x8x8xf32>
    %37 = arith.mulf %32, %36 : vector<2x8x8xf32>
    %38 = arith.truncf %37 : vector<2x8x8xf32> to vector<2x8x8xbf16>
    "tpu.trace_start"() <{level = 10 : i32, message = "bqk,bkd->bqd"}> : () -> ()
    %cst_12 = arith.constant dense<0.000000e+00> : vector<2x8x16xf32>
    %39 = tpu.matmul %38, %26, %cst_12 {dimension_numbers = #tpu.dot_dimension_numbers<[2], [1], [1], [2], [0, 0, 0, 1, 1, 2], [0], [0]>} : vector<2x8x8xbf16>, vector<2x8x16xbf16>, vector<2x8x16xf32> -> vector<2x8x16xf32>
    "tpu.trace_stop"() : () -> ()
    %40 = tpu.concatenate %23, %39 in 2 : vector<2x8x16xf32>, vector<2x8x16xf32> -> vector<2x8x32xf32>
    %41 = vector.shape_cast %40 : vector<2x8x32xf32> to vector<16x32xf32>
    %c0_13 = arith.constant 0 : index
    %c0_14 = arith.constant 0 : index
    %42 = vector.load %arg4[%c0_13, %c0_14] : memref<16x32xf32, #tpu.memory_space<vmem>>, vector<16x32xf32>
    tpu.vector_store %arg4[%c0_13, %c0_14], %41 {strides = array<i32>} : memref<16x32xf32, #tpu.memory_space<vmem>>, vector<16x32xf32>,
    return
  }
  func.func @transform_0(%arg0: i32) -> (i32, i32) {
    %c0_i32 = arith.constant 0 : i32
    %c0_i32_0 = arith.constant 0 : i32
    return %arg0, %c0_i32 : i32, i32
  }
  func.func @transform_1(%arg0: i32) -> (i32, i32) {
    %c0_i32 = arith.constant 0 : i32
    %c0_i32_0 = arith.constant 0 : i32
    %c0_i32_1 = arith.constant 0 : i32
    return %c0_i32, %c0_i32_0 : i32, i32
  }
  func.func @transform_2(%arg0: i32) -> (i32, i32) {
    %c0_i32 = arith.constant 0 : i32
    %c0_i32_0 = arith.constant 0 : i32
    %c0_i32_1 = arith.constant 0 : i32
    return %c0_i32, %c0_i32_0 : i32, i32
  }
  func.func @transform_3(%arg0: i32) -> (i32, i32) {
    %c0_i32 = arith.constant 0 : i32
    %c0_i32_0 = arith.constant 0 : i32
    return %arg0, %c0_i32 : i32, i32
  }
}

</mosaic_0001>

<bundles_post_ra>
// kernel: tpu_custom_call.1
= control target key start
LH: loop header
LB: loop body
LE: loop exit
PB: predicated region body
PF: predicated region fallthrough
CT: control target
= control target key end

     0   :  { %8 = vsyncpa [#allocation3], 0  ;;  %s916_s0 = inlined_call_operand.hbm [shape: bf16[16,32], index: 0, kind: input, shape index: {}]   ;;  %s917_s1 = inlined_call_operand.hbm [shape: bf16[32,96], index: 1, kind: input, shape index: {}]   ;;  %s918_s2 = inlined_call_operand.vmem [shape: f32[1,96], index: 2, kind: input, shape index: {}]   ;;  %s919_s3 = inlined_call_operand.hbm [shape: f32[16,32], index: 3, kind: output, shape index: {}]  }
   0x1   :  { %9 = vsyncpa [#allocation6], 0 }
   0x2   :  { %10 = vsyncpa [#allocation4], 0  ;;  %s785_s12 = smov [#allocation2]  }
   0x3   :  { %s16_s13 = sshll.u32 %s785_s12, 4  ;;  %s17_s13 = int_to_ptr.vmem [resolvable:$true] %s16_s13 }
   0x4   :  { %s727_s14 = scalar_lea.vmem %s17_s13, 128  ;;  %p732_p1 = scmp.lt.s32.totalorder %s17_s13, %s17_s13 }
   0x5   :  { %p728_p0 = scmp.ne.s32.totalorder %s17_s13, %s727_s14  ;;  %p733_p2 = scmp.lt.s32.totalorder %s727_s14, %s727_s14 }
   0x7   :  { %p734_p3 = por %p733_p2, %p732_p1 }
   0x9   :  { %p735_p4 = pnand %p734_p3, %p728_p0 }
   0xb   :  { %738 = shalt.err (!%p735_p4)
}
   0xc   :  { %s786_s15 = smov 64   ;;  %s787_s16 = smov 4  }
   0xd   :  { %22 = dma.hbm_to_vmem [thread:$0]  %s916_s0, 128, %s17_s13, [#allocation3], %s786_s15, %s786_s15, %s787_s16  }
   0xe   :  { %s788_s19 = smov [#allocation5]  }
   0xf   :  { %s28_s20 = sshll.u32 %s788_s19, 4  ;;  %s29_s20 = int_to_ptr.vmem [resolvable:$true] %s28_s20 }
  0x10   :  { %s747_s21 = scalar_lea.vmem %s29_s20, 256  ;;  %p752_p6 = scmp.lt.s32.totalorder %s29_s20, %s29_s20 }
  0x11   :  { %p748_p5 = scmp.ne.s32.totalorder %s29_s20, %s747_s21  ;;  %p753_p7 = scmp.lt.s32.totalorder %s747_s21, %s747_s21 }
  0x13   :  { %p754_p8 = por %p753_p7, %p752_p6 }
  0x15   :  { %p755_p9 = pnand %p754_p8, %p748_p5 }
  0x17   :  { %758 = shalt.err (!%p755_p9)
}
  0x18   :  { %34 = dma.hbm_to_vmem [thread:$0]  %s917_s1, 256, %s29_s20, [#allocation6], %s786_s15, %s786_s15, %s787_s16  }
  0x19   :  { %779 = dma.done.wait [#allocation3], 128  }
  0x1a   :  { %780 = vsyncadd [#allocation3], 4294967168 }
  0x1b   :  { %781 = dma.done.wait [#allocation6], 256  }
  0x1c   :  { %782 = vsyncadd [#allocation6], 4294967040  ;;  %v789_v0 = vmov 0.0   ;;  %vm790_vm0 = vmmov 0   ;;  %v700_v1 = vld [vmem:[#allocation5 + $0x8] sm:$0xff]   ;;  %v701_v2 = vld [vmem:[#allocation5] sm:$0xff]  }
  0x1d   :  { %630 = vmatprep.subr.bf16.mxu0 %v789_v0  ;;  %634 = vmatprep.mubr.msk.bf16.mxu0 %vm790_vm0, %v789_v0  ;;  %v702_v3 = vld [vmem:[#allocation2] sm:$0xff]   ;;  %vm74_vm1 = vcmask 261120   ;;  %s791_s24 = smov 96   ;;  %vm127_vm2 = vcmask 130048   ;;  %vm222_vm3 = vcmask 64512   ;;  %vm252_vm4 = vcmask 1043456  }
  0x1e   :  { %638 = vmatprep.subr.bf16.mxu1 %v789_v0  ;;  %640 = vmatprep.mubr.msk.bf16.mxu1 %vm790_vm0, %v789_v0  ;;  %v594_v4 = vld [vmem:[%s918_s2] ss:$0 sm:$0xff]  ;;  %s792_s2 = smov 80   ;;  %s793_s25 = smov 112  }
  0x1f   :  { %631 = vmatpush3.bf16.msra.mxu0 %v700_v1  ;;  %s794_s26 = smov 48   ;;  %s795_s27 = smov 16  }
  0x20   :  { %632 = vmatprep.subr.bf16.mxu0 %v789_v0  ;;  %s796_s28 = smov [#allocation7]  }
  0x21   :  { %s581_s29 = sshll.u32 %s796_s28, 4  ;;  %s582_s29 = int_to_ptr.vmem [resolvable:$true] %s581_s29 }
  0x22   :  { %s759_s30 = scalar_lea.vmem %s582_s29, 256  ;;  %p764_p11 = scmp.lt.s32.totalorder %s582_s29, %s582_s29 }
  0x23   :  { %633 = vmatpush3.bf16.msra.mxu0 %v701_v2  ;;  %p760_p10 = scmp.ne.s32.totalorder %s582_s29, %s759_s30  ;;  %p765_p12 = scmp.lt.s32.totalorder %s759_s30, %s759_s30 }
  0x24   :  { %644 = vmatprep.subr.bf16.mxu0 %v789_v0 }
  0x25   :  { %p766_p13 = por %p765_p12, %p764_p11 }
  0x26   :  { %635 = vmatmul.mubr.msk.bf16.vlgmr.msra.gmra.mxu0 %vm74_vm1, %v702_v3 }
  0x27   :  { %646 = vmatprep.mubr.msk.bf16.mxu0 %vm790_vm0, %v789_v0  ;;  %p767_p0 = pnand %p766_p13, %p760_p10 }
  0xe6   :  { %v112_v5 = vpop.f32.mrf.mxu0 }
  0xe7   :  { %v113_v6 = vadd.f32 %v594_v4, %v112_v5 }
  0xe8   :  { %v636_v7 = vpop.f32.mrf.mxu0 }
  0xe9   :  { %v843_v8 = vpack.c.bf16 %v113_v6, %v113_v6 }
  0xea   :  { %v115_v9 = vpop.f32.mrf.mxu0 }
  0xeb   :  { %v116_v10 = vadd.f32 %v594_v4, %v115_v9  ;;  %125 = vrot.lane.b32.xlu0 %v843_v8, %s791_s24 }
  0xec   :  { %v637_v11 = vpop.f32.mrf.mxu0 }
  0xed   :  { %v846_v12 = vpack.c.bf16 %v116_v10, %v116_v10 }
  0xef   :  { %174 = vrot.lane.b32.xlu0 %v846_v12, %s791_s24 }
 0x15d   :  { %v126_v13 = vpop.permute.xlu0 %125 }
 0x15e   :  { %v132_v14 = vsel %vm127_vm2, %v126_v13, 0 }
 0x15f   :  { %639 = vmatpush3.bf16.xpose.msra.mxu1 %v132_v14 }
 0x160   :  { %650 = vmatprep.subr.bf16.mxu1 %v789_v0 }
 0x161   :  { %v175_v15 = vpop.permute.xlu0 %174 }
 0x162   :  { %v180_v16 = vsel %vm127_vm2, %v175_v15, 0 }
 0x163   :  { %645 = vmatpush3.bf16.xpose.msra.mxu0 %v180_v16 }
 0x164   :  { %656 = vmatprep.subr.bf16.mxu0 %v789_v0 }
 0x166   :  { %641 = vmatmul.mubr.msk.bf16.vlgmr.msra.gmra.mxu1 %vm127_vm2, %v843_v8 }
 0x167   :  { %652 = vmatprep.mubr.msk.bf16.mxu1 %vm790_vm0, %v789_v0 }
 0x16a   :  { %647 = vmatmul.mubr.msk.bf16.vlgmr.msra.gmra.mxu0 %vm127_vm2, %v846_v12 }
 0x16b   :  { %658 = vmatprep.mubr.msk.bf16.mxu0 %vm790_vm0, %v789_v0 }
 0x226   :  { %v168_v17 = vpop.f32.mrf.mxu1 }
 0x227   :  { %v223_v18 = vsel %vm222_vm3, %v168_v17, -inf }
 0x228   :  { %224 = vmax.xlane.f32.xlu1 %v223_v18  ;;  %v642_v19 = vpop.f32.mrf.mxu1 }
 0x22a   :  { %v171_v20 = vpop.f32.mrf.mxu1  ;;  %v216_v21 = vpop.f32.mrf.mxu0 }
 0x22b   :  { %v226_v22 = vsel %vm222_vm3, %v216_v21, -inf }
 0x22c   :  { %v643_v23 = vpop.f32.mrf.mxu1  ;;  %227 = vmax.xlane.f32.xlu1 %v226_v22  ;;  %v648_v24 = vpop.f32.mrf.mxu0 }
 0x22e   :  { %v219_v25 = vpop.f32.mrf.mxu0 }
 0x230   :  { %v649_v26 = vpop.f32.mrf.mxu0 }
 0x23d   :  { %247 = vrot.lane.b32.xlu1 %v843_v8, %s786_s15 }
 0x241   :  { %296 = vrot.lane.b32.xlu1 %v846_v12, %s786_s15 }
 0x245   :  { %346 = vrot.lane.b32.xlu1 %v843_v8, %s792_s2 }
 0x2b1   :  { %v225_v27 = vpop.xlane.xlu1 %224 }
 0x2b2   :  { %v229_v28 = vsub.f32 %v168_v17, %v225_v27 }
 0x2b4   :  { %v231_v29 = vmul.f32 1.442695, %v229_v28 }
 0x2b5   :  { %v228_v30 = vpop.xlane.xlu1 %227 }
 0x2b6   :  { %703 = vpow2.f32 %v231_v29  ;;  %v230_v31 = vsub.f32 %v216_v21, %v228_v30 }
 0x2b8   :  { %v233_v32 = vmul.f32 1.442695, %v230_v31 }
 0x2b9   :  { %v248_v33 = vpop.permute.xlu1 %247 }
 0x2ba   :  { %705 = vpow2.f32 %v233_v32  ;;  %v254_v34 = vsel %vm252_vm4, %v248_v33, 0 }
 0x2bb   :  { %651 = vmatpush3.bf16.msra.mxu1 %v254_v34 }
 0x2bc   :  { %662 = vmatprep.subr.bf16.mxu1 %v789_v0 }
 0x2bd   :  { %v297_v35 = vpop.permute.xlu1 %296 }
 0x2be   :  { %v302_v36 = vsel %vm252_vm4, %v297_v35, 0 }
 0x2bf   :  { %657 = vmatpush3.bf16.msra.mxu0 %v302_v36 }
 0x2c0   :  { %668 = vmatprep.subr.bf16.mxu0 %v789_v0 }
 0x2c1   :  { %v347_v41 = vpop.permute.xlu1 %346 }
 0x2c2   :  { %v352_v48 = vsel %vm127_vm2, %v347_v41, 0 }
 0x2c3   :  { %v704_v37 = vpop.eup %703 }
 0x2c4   :  { %v235_v38 = vsel %vm222_vm3, %v704_v37, 0.0 }
 0x2c5   :  { %236 = vadd.xlane.f32.xlu0 %v235_v38 }
 0x2c7   :  { %v706_v39 = vpop.eup %705 }
 0x2c8   :  { %v238_v40 = vsel %vm222_vm3, %v706_v39, 0.0 }
 0x2c9   :  { %239 = vadd.xlane.f32.xlu1 %v238_v40 }
 0x2da   :  { %396 = vrot.lane.b32.xlu1 %v846_v12, %s792_s2 }
 0x2db   :  { %344 = vrot.lane.b32.xlu0 %v843_v8, %s793_s25 }
 0x2de   :  { %394 = vrot.lane.b32.xlu1 %v846_v12, %s793_s25 }
 0x34e   :  { %v237_v42 = vpop.xlane.xlu0 %236 }
 0x34f   :  { %707 = vrcp.f32 %v237_v42 }
 0x352   :  { %v240_v43 = vpop.xlane.xlu1 %239  ;;  %v345_v53 = vpop.permute.xlu0 %344 }
 0x353   :  { %709 = vrcp.f32 %v240_v43 }
 0x356   :  { %v397_v50 = vpop.permute.xlu1 %396 }
 0x357   :  { %v402_v52 = vsel %vm127_vm2, %v397_v50, 0 }
 0x35a   :  { %v395_v54 = vpop.permute.xlu1 %394 }
 0x35c   :  { %v708_v44 = vpop.eup %707 }
 0x35d   :  { %v243_v45 = vmul.f32 %v708_v44, %v704_v37 }
 0x35f   :  { %v245_v46 = vpack.c.bf16 %v243_v45, %v243_v45 }
 0x360   :  { %v710_v47 = vpop.eup %709 }
 0x361   :  { %653 = vmatmul.mubr.msk.bf16.vlgmr.msra.gmra.mxu1 %vm222_vm3, %v245_v46  ;;  %v244_v49 = vmul.f32 %v710_v47, %v706_v39 }
 0x362   :  { %663 = vmatpush3.bf16.xpose.msra.mxu1 %v352_v48  ;;  %664 = vmatprep.mubr.msk.bf16.mxu1 %vm790_vm0, %v789_v0 }
 0x363   :  { %v246_v51 = vpack.c.bf16 %v244_v49, %v244_v49  ;;  %674 = vmatprep.subr.bf16.mxu1 %v789_v0 }
 0x365   :  { %659 = vmatmul.mubr.msk.bf16.vlgmr.msra.gmra.mxu0 %vm222_vm3, %v246_v51 }
 0x366   :  { %669 = vmatpush3.bf16.xpose.msra.mxu0 %v402_v52  ;;  %670 = vmatprep.mubr.msk.bf16.mxu0 %vm790_vm0, %v789_v0 }
 0x367   :  { %680 = vmatprep.subr.bf16.mxu0 %v789_v0 }
 0x369   :  { %665 = vmatmul.mubr.msk.bf16.vlgmr.msra.gmra.mxu1 %vm127_vm2, %v345_v53 }
 0x36a   :  { %676 = vmatprep.mubr.msk.bf16.mxu1 %vm790_vm0, %v789_v0 }
 0x36d   :  { %671 = vmatmul.mubr.msk.bf16.vlgmr.msra.gmra.mxu0 %vm127_vm2, %v395_v54 }
 0x36e   :  { %682 = vmatprep.mubr.msk.bf16.mxu0 %vm790_vm0, %v789_v0 }
 0x421   :  { %v893_v55 = vpop.f32.mrf.mxu1 }
 0x423   :  { %v654_v56 = vpop.f32.mrf.mxu1 }
 0x425   :  { %v293_v57 = vpop.f32.mrf.mxu1  ;;  %v895_v58 = vpop.f32.mrf.mxu0 }
 0x427   :  { %v655_v59 = vpop.f32.mrf.mxu1  ;;  %v660_v60 = vpop.f32.mrf.mxu0 }
 0x429   :  { %v341_v61 = vpop.f32.mrf.mxu0  ;;  %v388_v62 = vpop.f32.mrf.mxu1 }
 0x42a   :  { %v444_v63 = vsel %vm222_vm3, %v388_v62, -inf }
 0x42b   :  { %445 = vmax.xlane.f32.xlu1 %v444_v63  ;;  %v661_v1 = vpop.f32.mrf.mxu0  ;;  %v666_v2 = vpop.f32.mrf.mxu1 }
 0x42d   :  { %v391_v3 = vpop.f32.mrf.mxu1  ;;  %v438_v4 = vpop.f32.mrf.mxu0 }
 0x42e   :  { %v447_v5 = vsel %vm222_vm3, %v438_v4, -inf }
 0x42f   :  { %v667_v0 = vpop.f32.mrf.mxu1  ;;  %448 = vmax.xlane.f32.xlu0 %v447_v5  ;;  %v672_v6 = vpop.f32.mrf.mxu0 }
 0x431   :  { %v441_v7 = vpop.f32.mrf.mxu0 }
 0x433   :  { %v673_v9 = vpop.f32.mrf.mxu0 }
 0x445   :  { %516 = vrot.lane.b32.xlu0 %v846_v12, %s794_s26 }
 0x4b4   :  { %v446_v10 = vpop.xlane.xlu1 %445 }
 0x4b5   :  { %v450_v11 = vsub.f32 %v388_v62, %v446_v10 }
 0x4b7   :  { %v452_v13 = vmul.f32 1.442695, %v450_v11 }
 0x4b8   :  { %v449_v14 = vpop.xlane.xlu0 %448 }
 0x4b9   :  { %711 = vpow2.f32 %v452_v13  ;;  %v451_v15 = vsub.f32 %v438_v4, %v449_v14 }
 0x4bb   :  { %v454_v16 = vmul.f32 1.442695, %v451_v15 }
 0x4bc   :  { %v517_v17 = vpop.permute.xlu0 %516 }
 0x4bd   :  { %713 = vpow2.f32 %v454_v16  ;;  %v522_v18 = vsel %vm252_vm4, %v517_v17, 0 }
 0x4be   :  { %681 = vmatpush3.bf16.msra.mxu0 %v522_v18 }
 0x4c6   :  { %v712_v19 = vpop.eup %711 }
 0x4c7   :  { %v456_v20 = vsel %vm222_vm3, %v712_v19, 0.0 }
 0x4c8   :  { %457 = vadd.xlane.f32.xlu1 %v456_v20 }
 0x4ca   :  { %v714_v21 = vpop.eup %713 }
 0x4cb   :  { %v459_v22 = vsel %vm222_vm3, %v714_v21, 0.0 }
 0x4cc   :  { %460 = vadd.xlane.f32.xlu1 %v459_v22 }
 0x4dd   :  { %468 = vrot.lane.b32.xlu1 %v843_v8, %s794_s26 }
 0x551   :  { %v458_v12 = vpop.xlane.xlu1 %457 }
 0x552   :  { %715 = vrcp.f32 %v458_v12 }
 0x555   :  { %v461_v23 = vpop.xlane.xlu1 %460 }
 0x556   :  { %717 = vrcp.f32 %v461_v23 }
 0x559   :  { %v469_v24 = vpop.permute.xlu1 %468 }
 0x55a   :  { %v474_v25 = vsel %vm252_vm4, %v469_v24, 0 }
 0x55b   :  { %675 = vmatpush3.bf16.msra.mxu1 %v474_v25 }
 0x55f   :  { %v716_v26 = vpop.eup %715 }
 0x560   :  { %v464_v27 = vmul.f32 %v716_v26, %v712_v19 }
 0x562   :  { %v466_v28 = vpack.c.bf16 %v464_v27, %v464_v27 }
 0x563   :  { %v718_v29 = vpop.eup %717 }
 0x564   :  { %677 = vmatmul.mubr.msk.bf16.vlgmr.msra.gmra.mxu1 %vm222_vm3, %v466_v28  ;;  %v465_v30 = vmul.f32 %v718_v29, %v714_v21 }
 0x566   :  { %v467_v31 = vpack.c.bf16 %v465_v30, %v465_v30 }
 0x568   :  { %683 = vmatmul.mubr.msk.bf16.vlgmr.msra.gmra.mxu0 %vm222_vm3, %v467_v31 }
 0x624   :  { %v510_v32 = vpop.f32.mrf.mxu1 }
 0x625   :  { %566 = vrot.lane.b32.xlu1 %v510_v32, %s795_s27 }
 0x626   :  { %v678_v8 = vpop.f32.mrf.mxu1 }
 0x628   :  { %v513_v33 = vpop.f32.mrf.mxu1  ;;  %v558_v34 = vpop.f32.mrf.mxu0 }
 0x629   :  { %568 = vrot.lane.b32.xlu1 %v558_v34, %s795_s27 }
 0x62a   :  { %v679_v35 = vpop.f32.mrf.mxu1  ;;  %v684_v36 = vpop.f32.mrf.mxu0 }
 0x62c   :  { %v561_v37 = vpop.f32.mrf.mxu0 }
 0x62e   :  { %v685_v38 = vpop.f32.mrf.mxu0 }
 0x697   :  { %v567_v39 = vpop.permute.xlu1 %566 }
 0x698   :  { %v572_v40 = vsel %vm127_vm2, %v893_v55, %v567_v39 }
 0x699   :  { %574 = vst.msk [vmem:[#allocation7] sm:$0xff] %vm74_vm1, %v572_v40 }
 0x69b   :  { %v569_v41 = vpop.permute.xlu1 %568 }
 0x69c   :  { %v573_v42 = vsel %vm127_vm2, %v895_v58, %v569_v41 }
 0x69d   :  { %575 = vst.msk [vmem:[#allocation7 + $0x8] sm:$0xff] %vm74_vm1, %v573_v42 }
 0x69e   :  { %770 = shalt.err (!%p767_p0)
}
 0x69f   :  { %s797_s4 = smov 128   ;;  %s798_s5 = smov 8  }
 0x6a0   :  { %587 = dma.vmem_to_hbm [thread:$0]  %s582_s29, 256, %s919_s3, [#allocation4], %s797_s4, %s797_s4, %s798_s5  }
 0x6a1   :  { %783 = dma.done.wait [#allocation4], 256  }
 0x6a2   :  { %784 = vsyncadd [#allocation4], 4294967040 }
 0x6a3   :  { %591 = vsyncpa [#allocation3], 1 }
 0x6a4   :  { %592 = vsyncpa [#allocation6], 1 }
 0x6a5   :  { %593 = vsyncpa [#allocation4], 1 }

</bundles_post_ra>
